<compile_context>
chip_gen: v7x
topology: tpu7x:2x2x1
jax: 0.10.0
libtpu: 0.0.40
codegen_flags: <defaults>
</compile_context>

<pallas_src>
import jax
import jax.numpy as jnp
from jax.experimental import pallas as pl
from jax.experimental.pallas import tpu as pltpu


def _round_up(v, m):
    return (v + m - 1) // m * m


def _largest_divisor_leq(n, cap):
    cap = max(1, min(n, cap))
    for d in range(cap, 0, -1):
        if n % d == 0:
            return d
    return 1


def _conv3_relu_kernel(x_ref, w_ref, b_ref, o_ref):
    """One (batch-tile, L-tile) grid step.

    x_ref: (Bt, Lt+2, Cin)  padded sequences of Bt batch elements; block index
                            depends only on the batch-tile axis -> resident
                            across all L-tiles (no re-DMA).
    w_ref: (3, Cin, Cout)   one (Cin, Cout) matrix per conv tap (resident).
    b_ref: (1, Cout)        bias (resident, f32).
    o_ref: (Bt, tl, Cout)   exact-width output tile (masked store if Cout<128).
    """
    bt, tl, cout = o_ref.shape
    cin = x_ref.shape[-1]

    j = pl.program_id(1)
    base = pl.multiple_of(j * tl, 8)  # tl is a multiple of 8

    def tap(k):
        # Shifted (Bt, tl, Cin) window of the resident sequence; fold the batch
        # dim into the matmul M dim (free re-tiling since tl % 8 == 0) so small
        # L still feeds the MXU a tall LHS instead of Bt tiny matmuls.
        return x_ref[:, pl.ds(base + k, tl), :].reshape(bt * tl, cin)

    acc = jnp.dot(tap(0), w_ref[0], preferred_element_type=jnp.float32)
    acc = acc + jnp.dot(tap(1), w_ref[1], preferred_element_type=jnp.float32)
    acc = acc + jnp.dot(tap(2), w_ref[2], preferred_element_type=jnp.float32)
    acc = acc + b_ref[...].astype(jnp.float32)
    o_ref[...] = jnp.maximum(acc, 0.0).reshape(bt, tl, cout).astype(o_ref.dtype)


def item_embedding_adapter(x, weight, bias, keep_dim=True, *,
                           max_l_tile=512, compute_dtype=None):
    """Pallas implementation of ItemEmbeddingAdapter.forward (channels-last).

    x:      (B, L, Cin)       float32
    weight: (Cout, Cin, 3)    PyTorch Conv1d weight layout
    bias:   (Cout,)
    returns (B, Lout, Cout)   with Lout = L if keep_dim else L - 2
    """
    B, L, Cin = x.shape
    Cout = weight.shape[0]
    assert weight.shape == (Cout, Cin, 3)

    Lout = L if keep_dim else L - 2
    assert Lout > 0, "sequence too short for kernel_size=3 without padding"

    out_dtype = x.dtype
    cdtype = jnp.dtype(compute_dtype) if compute_dtype is not None else jnp.dtype(x.dtype)
    itm = cdtype.itemsize
    sub = 32 // itm                      # sublane granularity (8 f32, 16 bf16)

    # --- L tiling -------------------------------------------------------------
    max_l_tile = _round_up(max(max_l_tile, sub), sub)
    tl = min(max_l_tile, _round_up(Lout, sub))
    num_l_tiles = pl.cdiv(Lout, tl)
    Lt = num_l_tiles * tl

    # --- batch packing (fill matmul M dim / amortize per-step overhead) -------
    target_rows = 256                    # MXU M on v6e/v7x
    Bt = _largest_divisor_leq(B, max(1, target_rows // tl))

    # --- VMEM budget (lane dims rounded to 128, sublanes to `sub`, 2x buffers) -
    lane = 128

    def blocks_bytes(bt):
        x_blk = bt * _round_up(Lt + 2, sub) * _round_up(Cin, lane) * itm
        w_blk = 3 * _round_up(Cin, sub) * _round_up(Cout, lane) * itm
        b_blk = 8 * _round_up(Cout, lane) * 4
        o_blk = bt * _round_up(tl, 8) * _round_up(Cout, lane) * jnp.dtype(out_dtype).itemsize
        return 2 * (x_blk + w_blk + b_blk + o_blk)   # default double-buffering

    try:
        phys_vmem = int(pltpu.get_tpu_info().vmem_capacity_bytes)
    except Exception:
        phys_vmem = 64 * 1024 * 1024     # assume the smallest generation (v7x/TC)
    budget = int(phys_vmem * 0.8)        # leave headroom for Mosaic scratch

    while Bt > 1 and blocks_bytes(Bt) > budget:
        Bt = _largest_divisor_leq(B, Bt - 1)
    # TODO(synk): if blocks_bytes(1) still exceeds the budget (huge L*Cin), switch
    # x to memory_space=pl.ANY + manual double-buffered halo-window DMAs.

    num_b_tiles = B // Bt
    needed = blocks_bytes(Bt)
    vmem_limit = int(min(max(needed + (4 << 20), 32 * 1024 * 1024), budget))

    # --- input prep -----------------------------------------------------------
    left = 1 if keep_dim else 0
    right = (Lt + 2) - (L + left)        # >= 0 by construction
    x_pad = jnp.pad(x, ((0, 0), (left, right), (0, 0)))

    w = jnp.transpose(weight, (2, 1, 0))                 # (3, Cin, Cout) per-tap
    b = bias.reshape(1, Cout).astype(jnp.float32)
    if cdtype != jnp.dtype(x.dtype):
        x_pad = x_pad.astype(cdtype)
        w = w.astype(cdtype)
    else:
        w = w.astype(cdtype)

    flops = 2 * 3 * B * Lt * Cin * Cout
    bytes_accessed = (x_pad.size * x_pad.dtype.itemsize
                      + w.size * w.dtype.itemsize + b.size * 4
                      + B * Lout * Cout * jnp.dtype(out_dtype).itemsize)

    out = pl.pallas_call(
        _conv3_relu_kernel,
        # Exact output shape: no Cout padding, no post-call slice; Pallas clips
        # the partial last L-tile automatically (tl % 8 == 0 keeps it legal).
        out_shape=jax.ShapeDtypeStruct((B, Lout, Cout), out_dtype),
        grid_spec=pltpu.PrefetchScalarGridSpec(
            num_scalar_prefetch=0,
            grid=(num_b_tiles, num_l_tiles),
            in_specs=[
                # Whole padded sequence of Bt batch elements; index depends only
                # on the batch-tile axis -> stays resident across L-tiles.
                pl.BlockSpec((Bt, Lt + 2, Cin), lambda bi, j: (bi, 0, 0)),
                # Resident weights / bias (constant index maps).
                # TODO(synk): pipeline_mode=pl.Buffered(1) to single-buffer these.
                pl.BlockSpec((3, Cin, Cout), lambda bi, j: (0, 0, 0)),
                pl.BlockSpec((1, Cout), lambda bi, j: (0, 0)),
            ],
            out_specs=pl.BlockSpec((Bt, tl, Cout), lambda bi, j: (bi, j, 0)),
        ),
        compiler_params=pltpu.CompilerParams(
            dimension_semantics=("parallel", "parallel"),
            vmem_limit_bytes=vmem_limit,
        ),
        cost_estimate=pl.CostEstimate(
            flops=flops, transcendentals=0, bytes_accessed=bytes_accessed),
    )(x_pad, w, b)

    return out


def _reference(x, weight, bias, keep_dim=True):
    # Pure-JAX reference of the PyTorch forward (for validation).
    B, L, Cin = x.shape
    if keep_dim:
        x_pad = jnp.pad(x, ((0, 0), (1, 1), (0, 0)))
        Lout = L
    else:
        x_pad = x
        Lout = L - 2
    cols = jnp.stack([x_pad[:, k:k + Lout, :] for k in range(3)], axis=2)
    out = jnp.einsum("btkc,okc->bto", cols,
                     jnp.transpose(weight, (0, 2, 1))) + bias
    return jnp.maximum(out, 0.0)


if __name__ == "__main__":
    key = jax.random.PRNGKey(0)
    k1, k2, k3 = jax.random.split(key, 3)

    B, L = 2, 16
    input_channels, output_channels = 4, 8

    x = jax.random.normal(k1, (B, L, input_channels), dtype=jnp.float32)
    # Deterministic "Conv1d" parameters (PyTorch shape: (out, in, kernel=3)).
    weight = 0.1 * jax.random.normal(
        k2, (output_channels, input_channels, 3), dtype=jnp.float32)
    bias = 0.1 * jax.random.normal(k3, (output_channels,), dtype=jnp.float32)

    # keep_dim=True path ('same' padding).
    out = jax.block_until_ready(
        item_embedding_adapter(x, weight, bias, keep_dim=True))
    ref = _reference(x, weight, bias, keep_dim=True)
    assert out.shape == (B, L, output_channels), out.shape
    assert jnp.allclose(out, ref, atol=1e-5, rtol=1e-5), "mismatch (keep_dim)"

    # keep_dim=False path ('valid' conv).
    out2 = jax.block_until_ready(
        item_embedding_adapter(x, weight, bias, keep_dim=False))
    ref2 = _reference(x, weight, bias, keep_dim=False)
    assert out2.shape == (B, L - 2, output_channels), out2.shape
    assert jnp.allclose(out2, ref2, atol=1e-5, rtol=1e-5), "mismatch (valid)"

    print("KERNEL_OK")
</pallas_src>

<mosaic_0001>
module attributes {stable_mosaic.version = 11 : i64} {
  func.func @_conv3_relu_kernel(%arg0: i32, %arg1: i32, %arg2: memref<2x18x4xf32, #tpu.memory_space<vmem>>, %arg3: memref<3x4x8xf32, #tpu.memory_space<vmem>>, %arg4: memref<1x8xf32, #tpu.memory_space<vmem>>, %arg5: memref<2x16x8xf32, #tpu.memory_space<vmem>>) attributes {dimension_semantics = [#tpu.dimension_semantics<parallel>, #tpu.dimension_semantics<parallel>], iteration_bounds = array<i64: 1, 1>, scalar_prefetch = 0 : i64, scratch_operands = 0 : i64, tpu.core_type = #tpu.core_type<tc>, window_params = [{transform_indices = @transform_0, window_bounds = array<i64: 2, 18, 4>}, {pipeline_mode = #tpu.pipeline_mode<synchronous>, transform_indices = @transform_1, window_bounds = array<i64: 3, 4, 8>}, {pipeline_mode = #tpu.pipeline_mode<synchronous>, transform_indices = @transform_2, window_bounds = array<i64: 1, 8>}, {transform_indices = @transform_3, window_bounds = array<i64: 2, 16, 8>}]} {
    %c16_i32 = arith.constant 16 : i32
    %0 = arith.muli %arg1, %c16_i32 : i32
    %1 = tpu.assume_multiple %0, 8 : i32
    %c0_i32 = arith.constant 0 : i32
    %2 = arith.addi %1, %c0_i32 : i32
    %c0 = arith.constant 0 : index
    %3 = arith.index_cast %2 : i32 to index
    %c0_0 = arith.constant 0 : index
    %4 = vector.load %arg2[%c0, %3, %c0_0] : memref<2x18x4xf32, #tpu.memory_space<vmem>>, vector<2x16x4xf32>
    %5 = vector.shape_cast %4 : vector<2x16x4xf32> to vector<32x4xf32>
    %c0_1 = arith.constant 0 : index
    %c0_2 = arith.constant 0 : index
    %c0_3 = arith.constant 0 : index
    %6 = vector.load %arg3[%c0_1, %c0_2, %c0_3] : memref<3x4x8xf32, #tpu.memory_space<vmem>>, vector<1x4x8xf32>
    %7 = vector.shape_cast %6 : vector<1x4x8xf32> to vector<4x8xf32>
    %cst = arith.constant dense<0.000000e+00> : vector<32x8xf32>
    %8 = tpu.matmul %5, %7, %cst {dimension_numbers = #tpu.dot_dimension_numbers<[1], [0], [0], [1], [0, 0, 1, 1], [], []>} : vector<32x4xf32>, vector<4x8xf32>, vector<32x8xf32> -> vector<32x8xf32>
    %c1_i32 = arith.constant 1 : i32
    %9 = arith.addi %1, %c1_i32 : i32
    %c0_4 = arith.constant 0 : index
    %10 = arith.index_cast %9 : i32 to index
    %c0_5 = arith.constant 0 : index
    %11 = vector.load %arg2[%c0_4, %10, %c0_5] : memref<2x18x4xf32, #tpu.memory_space<vmem>>, vector<2x16x4xf32>
    %12 = vector.shape_cast %11 : vector<2x16x4xf32> to vector<32x4xf32>
    %c1 = arith.constant 1 : index
    %c0_6 = arith.constant 0 : index
    %c0_7 = arith.constant 0 : index
    %13 = vector.load %arg3[%c1, %c0_6, %c0_7] : memref<3x4x8xf32, #tpu.memory_space<vmem>>, vector<1x4x8xf32>
    %14 = vector.shape_cast %13 : vector<1x4x8xf32> to vector<4x8xf32>
    %cst_8 = arith.constant dense<0.000000e+00> : vector<32x8xf32>
    %15 = tpu.matmul %12, %14, %cst_8 {dimension_numbers = #tpu.dot_dimension_numbers<[1], [0], [0], [1], [0, 0, 1, 1], [], []>} : vector<32x4xf32>, vector<4x8xf32>, vector<32x8xf32> -> vector<32x8xf32>
    %16 = arith.addf %8, %15 : vector<32x8xf32>
    %c2_i32 = arith.constant 2 : i32
    %17 = arith.addi %1, %c2_i32 : i32
    %c0_9 = arith.constant 0 : index
    %18 = arith.index_cast %17 : i32 to index
    %c0_10 = arith.constant 0 : index
    %19 = vector.load %arg2[%c0_9, %18, %c0_10] : memref<2x18x4xf32, #tpu.memory_space<vmem>>, vector<2x16x4xf32>
    %20 = vector.shape_cast %19 : vector<2x16x4xf32> to vector<32x4xf32>
    %c2 = arith.constant 2 : index
    %c0_11 = arith.constant 0 : index
    %c0_12 = arith.constant 0 : index
    %21 = vector.load %arg3[%c2, %c0_11, %c0_12] : memref<3x4x8xf32, #tpu.memory_space<vmem>>, vector<1x4x8xf32>
    %22 = vector.shape_cast %21 : vector<1x4x8xf32> to vector<4x8xf32>
    %cst_13 = arith.constant dense<0.000000e+00> : vector<32x8xf32>
    %23 = tpu.matmul %20, %22, %cst_13 {dimension_numbers = #tpu.dot_dimension_numbers<[1], [0], [0], [1], [0, 0, 1, 1], [], []>} : vector<32x4xf32>, vector<4x8xf32>, vector<32x8xf32> -> vector<32x8xf32>
    %24 = arith.addf %16, %23 : vector<32x8xf32>
    %c0_14 = arith.constant 0 : index
    %c0_15 = arith.constant 0 : index
    %25 = vector.load %arg4[%c0_14, %c0_15] : memref<1x8xf32, #tpu.memory_space<vmem>>, vector<1x8xf32>
    %26 = vector.broadcast %25 : vector<1x8xf32> to vector<32x8xf32>
    %27 = arith.addf %24, %26 : vector<32x8xf32>
    %cst_16 = arith.constant 0.000000e+00 : f32
    %28 = vector.broadcast %cst_16 : f32 to vector<32x8xf32>
    %29 = arith.maximumf %27, %28 : vector<32x8xf32>
    %30 = vector.shape_cast %29 : vector<32x8xf32> to vector<2x16x8xf32>
    %c0_17 = arith.constant 0 : index
    %c0_18 = arith.constant 0 : index
    %c0_19 = arith.constant 0 : index
    %31 = vector.load %arg5[%c0_17, %c0_18, %c0_19] : memref<2x16x8xf32, #tpu.memory_space<vmem>>, vector<2x16x8xf32>
    tpu.vector_store %arg5[%c0_17, %c0_18, %c0_19], %30 {strides = array<i32>} : memref<2x16x8xf32, #tpu.memory_space<vmem>>, vector<2x16x8xf32>,
    return
  }
  func.func @transform_0(%arg0: i32, %arg1: i32) -> (i32, i32, i32) {
    %c0_i32 = arith.constant 0 : i32
    %c0_i32_0 = arith.constant 0 : i32
    %c0_i32_1 = arith.constant 0 : i32
    return %arg0, %c0_i32, %c0_i32_0 : i32, i32, i32
  }
  func.func @transform_1(%arg0: i32, %arg1: i32) -> (i32, i32, i32) {
    %c0_i32 = arith.constant 0 : i32
    %c0_i32_0 = arith.constant 0 : i32
    %c0_i32_1 = arith.constant 0 : i32
    %c0_i32_2 = arith.constant 0 : i32
    return %c0_i32, %c0_i32_0, %c0_i32_1 : i32, i32, i32
  }
  func.func @transform_2(%arg0: i32, %arg1: i32) -> (i32, i32) {
    %c0_i32 = arith.constant 0 : i32
    %c0_i32_0 = arith.constant 0 : i32
    %c0_i32_1 = arith.constant 0 : i32
    return %c0_i32, %c0_i32_0 : i32, i32
  }
  func.func @transform_3(%arg0: i32, %arg1: i32) -> (i32, i32, i32) {
    %c0_i32 = arith.constant 0 : i32
    %c0_i32_0 = arith.constant 0 : i32
    return %arg0, %arg1, %c0_i32 : i32, i32, i32
  }
}

</mosaic_0001>

<bundles_post_ra>
// kernel: tpu_custom_call.1
= control target key start
LH: loop header
LB: loop body
LE: loop exit
PB: predicated region body
PF: predicated region fallthrough
CT: control target
= control target key end

     0   :  { %vm42_vm0 = vcmask 1043456   ;;  %vm29_vm1 = vcmask 31744   ;;  %vm358_vm2 = vcmask 64512   ;;  %s548_s1 = inlined_call_operand.vmem [shape: f32[3,4,8], index: 1, kind: input, shape index: {}]   ;;  %s549_s0 = inlined_call_operand.vmem [shape: f32[2,18,4], index: 0, kind: input, shape index: {}]   ;;  %s550_s2 = inlined_call_operand.vmem [shape: f32[1,8], index: 2, kind: input, shape index: {}]   ;;  %s551_s3 = inlined_call_operand.vmem [shape: f32[2,16,8], index: 3, kind: output, shape index: {}]  }
   0x1   :  { %v373_v0 = vld [vmem:[%s548_s1 + $0x4] sm:$0xf]  ;;  %v20_v1 = vld [vmem:[%s548_s1] sm:$0xf]  ;;  %v370_v4 = vld [vmem:[%s549_s0 + $0x9] sm:$0xff] }
   0x2   :  { %v369_v2 = vld [vmem:[%s549_s0 + $0x1] sm:$0xff]  ;;  %410 = vmatprep.subr.msk.mxu1 %vm42_vm0, %v373_v0  ;;  %418 = vmatprep.subr.msk.mxu0 %vm42_vm0, %v20_v1  ;;  %v371_v7 = vld [vmem:[%s549_s0 + $0x19] sm:$0xff]  ;;  %v385_v11 = vld [vmem:[%s549_s0 + $0xa] sm:$0xff] }
   0x3   :  { %v16_v3 = vld [vmem:[%s549_s0] sm:$0xff]  ;;  %411 = vmatpush3.msk.msra.mxu1 %vm42_vm0, %v373_v0  ;;  %412 = vmatprep.mubr.msk.f32.mxu1 %vm29_vm1, %v369_v2  ;;  %v17_v5 = vld [vmem:[%s549_s0 + $0x8] sm:$0xff]  ;;  %v18_v10 = vld [vmem:[%s549_s0 + $0x18] sm:$0xff] }
   0x4   :  { %v388_v6 = vld [vmem:[%s548_s1 + $0x8] sm:$0xf]  ;;  %419 = vmatpush3.msk.msra.mxu0 %vm42_vm0, %v20_v1  ;;  %420 = vmatprep.mubr.msk.f32.mxu0 %vm29_vm1, %v16_v3  ;;  %v386_v12 = vld [vmem:[%s549_s0 + $0x1a] sm:$0xff] }
   0x5   :  { %413 = vmatmul.mubr.msk.f32.vlgmr.msra.gmra.mrb[0].mxu1 %vm29_vm1, %v370_v4  ;;  %434 = vmatprep.subr.msk.mxu1 %vm42_vm0, %v20_v1  ;;  %v384_v8 = vld [vmem:[%s549_s0 + $0x2] sm:$0xff]  ;;  %v394_v18 = vld [vmem:[%s550_s2] ss:$0 sm:$0xff] }
   0x6   :  { %421 = vmatmul.mubr.msk.f32.vlgmr.msra.gmra.mrb[0].mxu0 %vm29_vm1, %v17_v5  ;;  %426 = vmatprep.subr.msk.mxu0 %vm42_vm0, %v388_v6  ;;  %v372_v9 = vld [vmem:[%s549_s0 + $0x21] sm:$0xff] }
   0x7   :  { %435 = vmatpush3.msk.msra.mxu1 %vm42_vm0, %v20_v1  ;;  %427 = vmatpush3.msk.msra.mxu0 %vm42_vm0, %v388_v6  ;;  %v19_v13 = vld [vmem:[%s549_s0 + $0x20] sm:$0xff] }
   0x8   :  { %415 = vmatprep.mubr.msk.f32.mxu1 %vm29_vm1, %v371_v7  ;;  %428 = vmatprep.mubr.msk.f32.mxu0 %vm29_vm1, %v384_v8  ;;  %v387_v14 = vld [vmem:[%s549_s0 + $0x22] sm:$0xff] }
   0x9   :  { %416 = vmatmul.mubr.msk.f32.gmra.mrb[2].mxu1 %vm29_vm1, %v372_v9 }
   0xa   :  { %423 = vmatprep.mubr.msk.f32.mxu1 %vm29_vm1, %v18_v10 }
   0xe   :  { %429 = vmatmul.mubr.msk.f32.vlgmr.msra.gmra.mrb[0].mxu0 %vm29_vm1, %v385_v11 }
   0xf   :  { %431 = vmatprep.mubr.msk.f32.mxu0 %vm29_vm1, %v386_v12 }
  0x11   :  { %424 = vmatmul.mubr.msk.f32.vlgmr.msra.gmra.mrb[2].mxu1 %vm29_vm1, %v19_v13 }
  0x12   :  { %432 = vmatmul.mubr.msk.f32.gmra.mrb[2].mxu0 %vm29_vm1, %v387_v14 }
  0xd8   :  { %v414_v15 = vpop.f32.mrb[0].mxu1 }
  0xd9   :  { %v112_v16 = vpop.f32.mrb[1].mxu1 }
  0xe1   :  { %v430_v17 = vpop.f32.mrb[0].mxu0 }
  0xe2   :  { %v436_v19 = vadd.f32 %v430_v17, %v414_v15  ;;  %v320_v20 = vpop.f32.mrb[1].mxu0 }
  0xe3   :  { %v437_v21 = vadd.f32 %v320_v20, %v112_v16 }
  0xe4   :  { %v351_v22 = vadd.f32 %v436_v19, %v394_v18  ;;  %v425_v23 = vpop.f32.mrb[2].mxu1 }
  0xe5   :  { %v350_v24 = vadd.f32 %v437_v21, %v394_v18  ;;  %v433_v25 = vpop.f32.mrb[2].mxu0  ;;  %v222_v26 = vpop.f32.mrb[3].mxu1 }
  0xe6   :  { %v355_v27 = vmax.f32 %v351_v22, 0.0  ;;  %v438_v28 = vadd.f32 %v433_v25, %v425_v23  ;;  %v330_v29 = vpop.f32.mrb[3].mxu0 }
  0xe7   :  { %v354_v30 = vmax.f32 %v350_v24, 0.0  ;;  %v439_v31 = vadd.f32 %v330_v29, %v222_v26 }
  0xe8   :  { %360 = vst.msk [vmem:[%s551_s3 + $0x8] sm:$0xff] %vm358_vm2, %v355_v27  ;;  %v353_v32 = vadd.f32 %v438_v28, %v394_v18 }
  0xe9   :  { %359 = vst.msk [vmem:[%s551_s3] sm:$0xff] %vm358_vm2, %v354_v30  ;;  %v352_v33 = vadd.f32 %v439_v31, %v394_v18 }
  0xea   :  { %v357_v34 = vmax.f32 %v353_v32, 0.0 }
  0xeb   :  { %v356_v35 = vmax.f32 %v352_v33, 0.0 }
  0xec   :  { %362 = vst.msk [vmem:[%s551_s3 + $0x18] sm:$0xff] %vm358_vm2, %v357_v34 }
  0xed   :  { %361 = vst.msk [vmem:[%s551_s3 + $0x10] sm:$0xff] %vm358_vm2, %v356_v35 }

</bundles_post_ra>
